<compile_context>
chip_gen: v6e
topology: v6e:2x2x1
jax: 0.10.0
libtpu: 0.0.40
codegen_flags: <defaults>
</compile_context>

<pallas_src>
import functools

import jax
import jax.numpy as jnp
from jax.experimental import pallas as pl
from jax.experimental.pallas import tpu as pltpu


def _round_up(x, m):
    return ((x + m - 1) // m) * m


def _cdiv(a, b):
    return (a + b - 1) // b


def _choose_batch_tile(b, tile_cap, align):
    """Spread padding over >=2 tiles (v7x megacore) with MXU-friendly sizes."""
    b_al = _round_up(max(b, 1), align)
    if b_al <= align:
        return b_al                           # tiny batch: single minimal tile
    n_tiles = max(2, _cdiv(b_al, tile_cap))   # >=2 grid steps when possible
    tb = _round_up(_cdiv(b, n_tiles), align)  # spread padding across tiles
    if tb >= 256:
        tb = _round_up(tb, 256)               # fill MXU row dimension
    return min(tb, tile_cap)


# ---------------------------------------------------------------------------
# Kernel (one program = one batch tile)
# ---------------------------------------------------------------------------
def _make_kernel(hidden_dim, n_actions, compute_dtype):
    H, A = hidden_dim, n_actions
    cdt = compute_dtype

    def kernel(obs_ref, h_ref, fc1w_ref, fc1b_ref,
               gxw_ref, ghw_ref, grub_ref, outw_ref, outb_ref, out_ref):
        h_prev = h_ref[...].astype(jnp.float32)                # (TB, H), f32 gate math

        # fc1 + ReLU  (MXU in compute dtype, f32 accumulation)
        x = jnp.maximum(
            jnp.dot(obs_ref[...], fc1w_ref[...],
                    preferred_element_type=jnp.float32) + fc1b_ref[...],
            0.0)                                               # (TB, H) f32

        # GRUCell: two (TB,H)@(H,4H) matmuls + add (no lane-axis concat).
        # column layout: gx -> [r_x | z_x | n_x | 0], gh -> [r_h | z_h | 0 | n_h]
        g = (jnp.dot(x.astype(cdt), gxw_ref[...],
                     preferred_element_type=jnp.float32)
             + jnp.dot(h_ref[...], ghw_ref[...],
                       preferred_element_type=jnp.float32)
             + grub_ref[...])                                  # (TB, 4H) f32
        r = jax.nn.sigmoid(g[:, :H])
        z = jax.nn.sigmoid(g[:, H:2 * H])
        n = jnp.tanh(g[:, 2 * H:3 * H] + r * g[:, 3 * H:4 * H])
        h_new = (1.0 - z) * n + z * h_prev                     # (TB, H) f32

        # fc2 into a lane-dense packed (TB, OUT_LANES) slab: q in lanes [0, A)
        out_ref[...] = (jnp.dot(h_new.astype(cdt), outw_ref[...],
                                preferred_element_type=jnp.float32)
                        + outb_ref[...])
        # h written directly (VPU store), not through an MXU identity matmul.
        out_ref[:, A:A + H] = h_new

    return kernel


# ---------------------------------------------------------------------------
# Host/trace-side weight packing (from PyTorch-layout parameters)
# ---------------------------------------------------------------------------
def pack_params(p, compute_dtype):
    f32 = jnp.float32
    fc1_w = p["fc1_weight"].astype(f32)        # (H, D_in)
    fc1_b = p["fc1_bias"].astype(f32)          # (H,)
    wih = p["weight_ih"].astype(f32)           # (3H, H)  rows: [r | z | n]
    whh = p["weight_hh"].astype(f32)           # (3H, H)
    bih = p["bias_ih"].astype(f32)             # (3H,)
    bhh = p["bias_hh"].astype(f32)             # (3H,)
    fc2_w = p["fc2_weight"].astype(f32)        # (A, H)
    fc2_b = p["fc2_bias"].astype(f32)          # (A,)

    H = whh.shape[1]
    A = fc2_w.shape[0]
    zeros_h = jnp.zeros((H, H), f32)

    # x-side GRU weight: cols [r_x | z_x | n_x | 0]  -> (H, 4H)
    gx_w = jnp.concatenate(
        [wih[:H].T, wih[H:2 * H].T, wih[2 * H:].T, zeros_h], axis=1)
    # h-side GRU weight: cols [r_h | z_h | 0 | n_h]  -> (H, 4H)
    gh_w = jnp.concatenate(
        [whh[:H].T, whh[H:2 * H].T, zeros_h, whh[2 * H:].T], axis=1)
    gru_b = jnp.concatenate(
        [bih[:H] + bhh[:H], bih[H:2 * H] + bhh[H:2 * H],
         bih[2 * H:], bhh[2 * H:]])[None, :]                   # (1, 4H)

    # Packed output weight: [fc2^T | 0] -> (H, OUT_LANES); h stored directly.
    out_lanes = max(128, _round_up(A + H, 128))
    out_w = jnp.concatenate(
        [fc2_w.T, jnp.zeros((H, out_lanes - A), f32)], axis=1)
    out_b = jnp.concatenate([fc2_b, jnp.zeros((out_lanes - A,), f32)])[None, :]

    slabs = dict(
        fc1w=fc1_w.T.astype(compute_dtype), fc1b=fc1_b[None, :],
        gxw=gx_w.astype(compute_dtype), ghw=gh_w.astype(compute_dtype),
        grub=gru_b,
        outw=out_w.astype(compute_dtype), outb=out_b)
    return slabs, H, A, out_lanes


# ---------------------------------------------------------------------------
# Wrapper (jitted so q/h slices + weight packing fuse into the same program)
# ---------------------------------------------------------------------------
@functools.partial(jax.jit, static_argnames=("tile_cap", "compute_dtype"))
def rnn_forward(obs, hidden_state, params, *, tile_cap=1024,
                compute_dtype=jnp.bfloat16):
    slabs, H, A, out_lanes = pack_params(params, compute_dtype)

    obs = obs.astype(compute_dtype)
    h_in = hidden_state.reshape(-1, H).astype(compute_dtype)  # mirrors forward()
    B, d_in = obs.shape

    # Sublane alignment: 16 rows for sub-32-bit operands, 8 for f32.
    align = 16 if jnp.dtype(compute_dtype).itemsize < 4 else 8
    tb = _choose_batch_tile(B, tile_cap, align)
    grid_b = _cdiv(B, tb)
    b_pad = grid_b * tb
    if b_pad != B:
        obs = jnp.pad(obs, ((0, b_pad - B), (0, 0)))
        h_in = jnp.pad(h_in, ((0, b_pad - B), (0, 0)))

    def batched(cols):
        return pl.BlockSpec((tb, cols), lambda i: (i, 0))

    def full(arr):
        return pl.BlockSpec(arr.shape, lambda i: (0, 0))

    weight_order = ("fc1w", "fc1b", "gxw", "ghw", "grub", "outw", "outb")
    weights = [slabs[k] for k in weight_order]

    out = pl.pallas_call(
        _make_kernel(H, A, compute_dtype),
        grid=(grid_b,),
        in_specs=[batched(d_in), batched(H)] + [full(w) for w in weights],
        out_specs=pl.BlockSpec((tb, out_lanes), lambda i: (i, 0)),
        out_shape=jax.ShapeDtypeStruct((b_pad, out_lanes), jnp.float32),
        compiler_params=pltpu.CompilerParams(
            dimension_semantics=("parallel",)),
    )(obs, h_in, *weights)

    # Slices fuse under this jit; padded rows (>= B) are never exposed.
    q = out[:B, :A]
    h = out[:B, A:A + H]
    return q, h


# ---------------------------------------------------------------------------
# Deterministic synthetic parameters (PyTorch layout) and pure-JAX reference
# ---------------------------------------------------------------------------
def init_params(key, input_dim, hidden_dim, n_actions):
    ks = jax.random.split(key, 8)

    def rnd(k, shape, scale):
        return jax.random.normal(k, shape, jnp.float32) * scale

    return {
        "fc1_weight": rnd(ks[0], (hidden_dim, input_dim), 0.2),
        "fc1_bias": rnd(ks[1], (hidden_dim,), 0.1),
        "weight_ih": rnd(ks[2], (3 * hidden_dim, hidden_dim), 0.2),
        "weight_hh": rnd(ks[3], (3 * hidden_dim, hidden_dim), 0.2),
        "bias_ih": rnd(ks[4], (3 * hidden_dim,), 0.1),
        "bias_hh": rnd(ks[5], (3 * hidden_dim,), 0.1),
        "fc2_weight": rnd(ks[6], (n_actions, hidden_dim), 0.2),
        "fc2_bias": rnd(ks[7], (n_actions,), 0.1),
    }


def reference_forward(obs, hidden_state, p):
    H = p["weight_hh"].shape[1]
    x = jnp.maximum(obs @ p["fc1_weight"].T + p["fc1_bias"], 0.0)
    h_in = hidden_state.reshape(-1, H)
    gi = x @ p["weight_ih"].T + p["bias_ih"]
    gh = h_in @ p["weight_hh"].T + p["bias_hh"]
    r = jax.nn.sigmoid(gi[:, :H] + gh[:, :H])
    z = jax.nn.sigmoid(gi[:, H:2 * H] + gh[:, H:2 * H])
    n = jnp.tanh(gi[:, 2 * H:] + r * gh[:, 2 * H:])
    h = (1.0 - z) * n + z * h_in
    q = h @ p["fc2_weight"].T + p["fc2_bias"]
    return q, h


if __name__ == "__main__":
    key = jax.random.PRNGKey(0)
    k_obs, k_hid, k_par = jax.random.split(key, 3)

    B = 2
    INPUT_SHAPE = 48      # input_shape
    RNN_HIDDEN = 32       # args.rnn_hidden_dim
    N_ACTIONS = 8         # args.n_actions

    obs = jax.random.normal(k_obs, (B, INPUT_SHAPE), jnp.float32)
    hidden_state = jax.random.normal(k_hid, (B, RNN_HIDDEN), jnp.float32)
    params = init_params(k_par, INPUT_SHAPE, RNN_HIDDEN, N_ACTIONS)

    q_ref, h_ref = reference_forward(obs, hidden_state, params)

    # 1) f32 operand path: semantics check at tight tolerance.
    q32, h32 = jax.block_until_ready(
        rnn_forward(obs, hidden_state, params, compute_dtype=jnp.float32))
    assert q32.shape == (B, N_ACTIONS) and h32.shape == (B, RNN_HIDDEN)
    assert jnp.allclose(q32, q_ref, atol=1e-3, rtol=1e-3)
    assert jnp.allclose(h32, h_ref, atol=1e-3, rtol=1e-3)

    # 2) default bf16 operand path (v6e/v7x fast path): bf16-level tolerance.
    qbf, hbf = jax.block_until_ready(rnn_forward(obs, hidden_state, params))
    assert qbf.shape == (B, N_ACTIONS) and hbf.shape == (B, RNN_HIDDEN)
    assert jnp.allclose(qbf, q_ref, atol=3e-2, rtol=3e-2)
    assert jnp.allclose(hbf, h_ref, atol=3e-2, rtol=3e-2)

    print("KERNEL_OK")
</pallas_src>

<mosaic_0001>
module attributes {stable_mosaic.version = 11 : i64} {
  func.func @kernel(%arg0: i32, %arg1: memref<8x48xf32, #tpu.memory_space<vmem>>, %arg2: memref<8x32xf32, #tpu.memory_space<vmem>>, %arg3: memref<48x32xf32, #tpu.memory_space<vmem>>, %arg4: memref<1x32xf32, #tpu.memory_space<vmem>>, %arg5: memref<32x128xf32, #tpu.memory_space<vmem>>, %arg6: memref<32x128xf32, #tpu.memory_space<vmem>>, %arg7: memref<1x128xf32, #tpu.memory_space<vmem>>, %arg8: memref<32x128xf32, #tpu.memory_space<vmem>>, %arg9: memref<1x128xf32, #tpu.memory_space<vmem>>, %arg10: memref<8x128xf32, #tpu.memory_space<vmem>>) attributes {dimension_semantics = [#tpu.dimension_semantics<parallel>], iteration_bounds = array<i64: 1>, scalar_prefetch = 0 : i64, scratch_operands = 0 : i64, tpu.core_type = #tpu.core_type<tc>, window_params = [{transform_indices = @transform_0, window_bounds = array<i64: 8, 48>}, {transform_indices = @transform_1, window_bounds = array<i64: 8, 32>}, {pipeline_mode = #tpu.pipeline_mode<synchronous>, transform_indices = @transform_2, window_bounds = array<i64: 48, 32>}, {pipeline_mode = #tpu.pipeline_mode<synchronous>, transform_indices = @transform_3, window_bounds = array<i64: 1, 32>}, {pipeline_mode = #tpu.pipeline_mode<synchronous>, transform_indices = @transform_4, window_bounds = array<i64: 32, 128>}, {pipeline_mode = #tpu.pipeline_mode<synchronous>, transform_indices = @transform_5, window_bounds = array<i64: 32, 128>}, {pipeline_mode = #tpu.pipeline_mode<synchronous>, transform_indices = @transform_6, window_bounds = array<i64: 1, 128>}, {pipeline_mode = #tpu.pipeline_mode<synchronous>, transform_indices = @transform_7, window_bounds = array<i64: 32, 128>}, {pipeline_mode = #tpu.pipeline_mode<synchronous>, transform_indices = @transform_8, window_bounds = array<i64: 1, 128>}, {transform_indices = @transform_9, window_bounds = array<i64: 8, 128>}]} {
    %c0 = arith.constant 0 : index
    %c0_0 = arith.constant 0 : index
    %0 = vector.load %arg2[%c0, %c0_0] : memref<8x32xf32, #tpu.memory_space<vmem>>, vector<8x32xf32>
    %c0_1 = arith.constant 0 : index
    %c0_2 = arith.constant 0 : index
    %1 = vector.load %arg1[%c0_1, %c0_2] : memref<8x48xf32, #tpu.memory_space<vmem>>, vector<8x48xf32>
    %c0_3 = arith.constant 0 : index
    %c0_4 = arith.constant 0 : index
    %2 = vector.load %arg3[%c0_3, %c0_4] : memref<48x32xf32, #tpu.memory_space<vmem>>, vector<48x32xf32>
    %cst = arith.constant dense<0.000000e+00> : vector<8x32xf32>
    %3 = tpu.matmul %1, %2, %cst {dimension_numbers = #tpu.dot_dimension_numbers<[1], [0], [0], [1], [0, 0, 1, 1], [], []>} : vector<8x48xf32>, vector<48x32xf32>, vector<8x32xf32> -> vector<8x32xf32>
    %c0_5 = arith.constant 0 : index
    %c0_6 = arith.constant 0 : index
    %4 = vector.load %arg4[%c0_5, %c0_6] : memref<1x32xf32, #tpu.memory_space<vmem>>, vector<1x32xf32>
    %5 = vector.broadcast %4 : vector<1x32xf32> to vector<8x32xf32>
    %6 = arith.addf %3, %5 : vector<8x32xf32>
    %cst_7 = arith.constant 0.000000e+00 : f32
    %7 = vector.broadcast %cst_7 : f32 to vector<8x32xf32>
    %8 = arith.maximumf %6, %7 : vector<8x32xf32>
    %c0_8 = arith.constant 0 : index
    %c0_9 = arith.constant 0 : index
    %9 = vector.load %arg5[%c0_8, %c0_9] : memref<32x128xf32, #tpu.memory_space<vmem>>, vector<32x128xf32>
    %cst_10 = arith.constant dense<0.000000e+00> : vector<8x128xf32>
    %10 = tpu.matmul %8, %9, %cst_10 {dimension_numbers = #tpu.dot_dimension_numbers<[1], [0], [0], [1], [0, 0, 1, 1], [], []>} : vector<8x32xf32>, vector<32x128xf32>, vector<8x128xf32> -> vector<8x128xf32>
    %c0_11 = arith.constant 0 : index
    %c0_12 = arith.constant 0 : index
    %11 = vector.load %arg2[%c0_11, %c0_12] : memref<8x32xf32, #tpu.memory_space<vmem>>, vector<8x32xf32>
    %c0_13 = arith.constant 0 : index
    %c0_14 = arith.constant 0 : index
    %12 = vector.load %arg6[%c0_13, %c0_14] : memref<32x128xf32, #tpu.memory_space<vmem>>, vector<32x128xf32>
    %cst_15 = arith.constant dense<0.000000e+00> : vector<8x128xf32>
    %13 = tpu.matmul %11, %12, %cst_15 {dimension_numbers = #tpu.dot_dimension_numbers<[1], [0], [0], [1], [0, 0, 1, 1], [], []>} : vector<8x32xf32>, vector<32x128xf32>, vector<8x128xf32> -> vector<8x128xf32>
    %14 = arith.addf %10, %13 : vector<8x128xf32>
    %c0_16 = arith.constant 0 : index
    %c0_17 = arith.constant 0 : index
    %15 = vector.load %arg7[%c0_16, %c0_17] : memref<1x128xf32, #tpu.memory_space<vmem>>, vector<1x128xf32>
    %16 = vector.broadcast %15 : vector<1x128xf32> to vector<8x128xf32>
    %17 = arith.addf %14, %16 : vector<8x128xf32>
    %18 = vector.extract_strided_slice %17 {offsets = [0, 0], sizes = [8, 32], strides = [1, 1]} : vector<8x128xf32> to vector<8x32xf32>
    %19 = arith.negf %18 : vector<8x32xf32>
    %20 = math.exp %19 : vector<8x32xf32>
    %cst_18 = arith.constant 1.000000e+00 : f32
    %21 = vector.broadcast %cst_18 : f32 to vector<8x32xf32>
    %22 = arith.addf %21, %20 : vector<8x32xf32>
    %23 = arith.divf %21, %22 : vector<8x32xf32>
    %24 = vector.extract_strided_slice %17 {offsets = [0, 32], sizes = [8, 32], strides = [1, 1]} : vector<8x128xf32> to vector<8x32xf32>
    %25 = arith.negf %24 : vector<8x32xf32>
    %26 = math.exp %25 : vector<8x32xf32>
    %cst_19 = arith.constant 1.000000e+00 : f32
    %27 = vector.broadcast %cst_19 : f32 to vector<8x32xf32>
    %28 = arith.addf %27, %26 : vector<8x32xf32>
    %29 = arith.divf %27, %28 : vector<8x32xf32>
    %30 = vector.extract_strided_slice %17 {offsets = [0, 64], sizes = [8, 32], strides = [1, 1]} : vector<8x128xf32> to vector<8x32xf32>
    %31 = vector.extract_strided_slice %17 {offsets = [0, 96], sizes = [8, 32], strides = [1, 1]} : vector<8x128xf32> to vector<8x32xf32>
    %32 = arith.mulf %23, %31 : vector<8x32xf32>
    %33 = arith.addf %30, %32 : vector<8x32xf32>
    %34 = math.tanh %33 : vector<8x32xf32>
    %cst_20 = arith.constant 1.000000e+00 : f32
    %35 = vector.broadcast %cst_20 : f32 to vector<8x32xf32>
    %36 = arith.subf %35, %29 : vector<8x32xf32>
    %37 = arith.mulf %36, %34 : vector<8x32xf32>
    %38 = arith.mulf %29, %0 : vector<8x32xf32>
    %39 = arith.addf %37, %38 : vector<8x32xf32>
    %c0_21 = arith.constant 0 : index
    %c0_22 = arith.constant 0 : index
    %40 = vector.load %arg8[%c0_21, %c0_22] : memref<32x128xf32, #tpu.memory_space<vmem>>, vector<32x128xf32>
    %cst_23 = arith.constant dense<0.000000e+00> : vector<8x128xf32>
    %41 = tpu.matmul %39, %40, %cst_23 {dimension_numbers = #tpu.dot_dimension_numbers<[1], [0], [0], [1], [0, 0, 1, 1], [], []>} : vector<8x32xf32>, vector<32x128xf32>, vector<8x128xf32> -> vector<8x128xf32>
    %c0_24 = arith.constant 0 : index
    %c0_25 = arith.constant 0 : index
    %42 = vector.load %arg9[%c0_24, %c0_25] : memref<1x128xf32, #tpu.memory_space<vmem>>, vector<1x128xf32>
    %43 = vector.broadcast %42 : vector<1x128xf32> to vector<8x128xf32>
    %44 = arith.addf %41, %43 : vector<8x128xf32>
    %c0_26 = arith.constant 0 : index
    %c0_27 = arith.constant 0 : index
    %45 = vector.load %arg10[%c0_26, %c0_27] : memref<8x128xf32, #tpu.memory_space<vmem>>, vector<8x128xf32>
    tpu.vector_store %arg10[%c0_26, %c0_27], %44 {strides = array<i32>} : memref<8x128xf32, #tpu.memory_space<vmem>>, vector<8x128xf32>,
    %c0_28 = arith.constant 0 : index
    %c8 = arith.constant 8 : index
    %46 = vector.load %arg10[%c0_28, %c8] : memref<8x128xf32, #tpu.memory_space<vmem>>, vector<8x32xf32>
    tpu.vector_store %arg10[%c0_28, %c8], %39 {strides = array<i32>} : memref<8x128xf32, #tpu.memory_space<vmem>>, vector<8x32xf32>,
    return
  }
  func.func @transform_0(%arg0: i32) -> (i32, i32) {
    %c0_i32 = arith.constant 0 : i32
    %c0_i32_0 = arith.constant 0 : i32
    return %arg0, %c0_i32 : i32, i32
  }
  func.func @transform_1(%arg0: i32) -> (i32, i32) {
    %c0_i32 = arith.constant 0 : i32
    %c0_i32_0 = arith.constant 0 : i32
    return %arg0, %c0_i32 : i32, i32
  }
  func.func @transform_2(%arg0: i32) -> (i32, i32) {
    %c0_i32 = arith.constant 0 : i32
    %c0_i32_0 = arith.constant 0 : i32
    %c0_i32_1 = arith.constant 0 : i32
    return %c0_i32, %c0_i32_0 : i32, i32
  }
  func.func @transform_3(%arg0: i32) -> (i32, i32) {
    %c0_i32 = arith.constant 0 : i32
    %c0_i32_0 = arith.constant 0 : i32
    %c0_i32_1 = arith.constant 0 : i32
    return %c0_i32, %c0_i32_0 : i32, i32
  }
  func.func @transform_4(%arg0: i32) -> (i32, i32) {
    %c0_i32 = arith.constant 0 : i32
    %c0_i32_0 = arith.constant 0 : i32
    %c0_i32_1 = arith.constant 0 : i32
    return %c0_i32, %c0_i32_0 : i32, i32
  }
  func.func @transform_5(%arg0: i32) -> (i32, i32) {
    %c0_i32 = arith.constant 0 : i32
    %c0_i32_0 = arith.constant 0 : i32
    %c0_i32_1 = arith.constant 0 : i32
    return %c0_i32, %c0_i32_0 : i32, i32
  }
  func.func @transform_6(%arg0: i32) -> (i32, i32) {
    %c0_i32 = arith.constant 0 : i32
    %c0_i32_0 = arith.constant 0 : i32
    %c0_i32_1 = arith.constant 0 : i32
    return %c0_i32, %c0_i32_0 : i32, i32
  }
  func.func @transform_7(%arg0: i32) -> (i32, i32) {
    %c0_i32 = arith.constant 0 : i32
    %c0_i32_0 = arith.constant 0 : i32
    %c0_i32_1 = arith.constant 0 : i32
    return %c0_i32, %c0_i32_0 : i32, i32
  }
  func.func @transform_8(%arg0: i32) -> (i32, i32) {
    %c0_i32 = arith.constant 0 : i32
    %c0_i32_0 = arith.constant 0 : i32
    %c0_i32_1 = arith.constant 0 : i32
    return %c0_i32, %c0_i32_0 : i32, i32
  }
  func.func @transform_9(%arg0: i32) -> (i32, i32) {
    %c0_i32 = arith.constant 0 : i32
    %c0_i32_0 = arith.constant 0 : i32
    return %arg0, %c0_i32 : i32, i32
  }
}

</mosaic_0001>

<bundles_post_ra>
// kernel: rnn_forward.1
= control target key start
LH: loop header
LB: loop body
LE: loop exit
PB: predicated region body
PF: predicated region fallthrough
CT: control target
= control target key end

     0   :  { %v499_v0 = vmov 0.0   ;;  %vm500_vm0 = vmmov 0   ;;  %vm130_vm1 = vcmask 261120   ;;  %vm47_vm2 = vcmask 392192   ;;  %s503_s25 = smov 96   ;;  %s504_s28 = smov 104   ;;  %s663_s2 = inlined_call_operand.vmem [shape: f32[48,32], index: 2, kind: input, shape index: {}]   ;;  %s664_s5 = inlined_call_operand.vmem [shape: f32[32,128], index: 5, kind: input, shape index: {}]   ;;  %s665_s1 = inlined_call_operand.vmem [shape: f32[8,32], index: 1, kind: input, shape index: {}]   ;;  %s666_s0 = inlined_call_operand.vmem [shape: f32[8,48], index: 0, kind: input, shape index: {}]   ;;  %s667_s4 = inlined_call_operand.vmem [shape: f32[32,128], index: 4, kind: input, shape index: {}]   ;;  %s668_s3 = inlined_call_operand.vmem [shape: f32[1,32], index: 3, kind: input, shape index: {}]   ;;  %s669_s6 = inlined_call_operand.vmem [shape: f32[1,128], index: 6, kind: input, shape index: {}]   ;;  %s670_s7 = inlined_call_operand.vmem [shape: f32[32,128], index: 7, kind: input, shape index: {}]   ;;  %s671_s8 = inlined_call_operand.vmem [shape: f32[1,128], index: 8, kind: input, shape index: {}]   ;;  %s672_s9 = inlined_call_operand.vmem [shape: f32[8,128], index: 9, kind: output, shape index: {}]  }
   0x1   :  { %439 = vmatprep.subr.mxu0 %v499_v0  ;;  %v39_v1 = vld [vmem:[%s663_s2 + $0x28] sm:$0xff]  ;;  %v38_v2 = vld [vmem:[%s663_s2 + $0x20] sm:$0xff]  ;;  %451 = vmatprep.mubr.msk.f32.mxu0 %vm500_vm0, %v499_v0  ;;  %v37_v3 = vld [vmem:[%s663_s2 + $0x18] sm:$0xff]  ;;  %vm403_vm3 = vcmask 326720  }
   0x2   :  { %440 = vmatpush3.msra.mxu0 %v39_v1  ;;  %454 = vmatprep.subr.mxu1 %v499_v0  ;;  %v129_v4 = vld [vmem:[%s664_s5 + $0x18] sm:$0xff]  ;;  %v128_v5 = vld [vmem:[%s664_s5 + $0x10] sm:$0xff]  ;;  %v127_v7 = vld [vmem:[%s664_s5 + $0x8] sm:$0xff] }
   0x3   :  { %441 = vmatprep.subr.mxu0 %v499_v0  ;;  %462 = vmatprep.mubr.msk.f32.mxu1 %vm500_vm0, %v499_v0  ;;  %v36_v6 = vld [vmem:[%s663_s2 + $0x10] sm:$0xff]  ;;  %v35_v8 = vld [vmem:[%s663_s2 + $0x8] sm:$0xff]  ;;  %v126_v9 = vld [vmem:[%s664_s5] sm:$0xff] }
   0x4   :  { %442 = vmatpush3.msra.mxu0 %v38_v2  ;;  %455 = vmatpush3.msra.mxu1 %v129_v4  ;;  %v596_v10 = vld [vmem:[%s665_s1] sm:$0xff]  ;;  %v125_v13 = vld [vmem:[%s667_s4 + $0x18] sm:$0xff]  ;;  %v124_v14 = vld [vmem:[%s667_s4 + $0x10] sm:$0xff] }
   0x5   :  { %443 = vmatprep.subr.mxu0 %v499_v0  ;;  %456 = vmatprep.subr.mxu1 %v499_v0  ;;  %v34_v11 = vld [vmem:[%s663_s2] sm:$0xff]  ;;  %v123_v15 = vld [vmem:[%s667_s4 + $0x8] sm:$0xff]  ;;  %v316_v37 = vld [vmem:[%s670_s7 + $0x18] sm:$0xff] }
   0x6   :  { %444 = vmatpush3.msra.mxu0 %v37_v3  ;;  %457 = vmatpush3.msra.mxu1 %v128_v5  ;;  %v33_v12 = vld [vmem:[%s666_s0] sm:$0xff]  ;;  %v315_v38 = vld [vmem:[%s670_s7 + $0x10] sm:$0xff]  ;;  %v314_v39 = vld [vmem:[%s670_s7 + $0x8] sm:$0xff] }
   0x7   :  { %445 = vmatprep.subr.mxu0 %v499_v0  ;;  %458 = vmatprep.subr.mxu1 %v499_v0  ;;  %v122_v16 = vld [vmem:[%s667_s4] sm:$0xff]  ;;  %s501_s4 = smov 32  }
   0x8   :  { %446 = vmatpush3.msra.mxu0 %v36_v6  ;;  %459 = vmatpush3.msra.mxu1 %v127_v7  ;;  %v409_v17 = vld [vmem:[%s668_s3] ss:$0 sm:$0xff]  ;;  %s502_s3 = smov 64  }
   0x9   :  { %447 = vmatprep.subr.mxu0 %v499_v0  ;;  %460 = vmatprep.subr.mxu1 %v499_v0  ;;  %v413_v25 = vld [vmem:[%s669_s6] ss:$0 sm:$0xff] }
   0xa   :  { %448 = vmatpush3.msra.mxu0 %v35_v8  ;;  %461 = vmatpush3.msra.mxu1 %v126_v9  ;;  %v313_v41 = vld [vmem:[%s670_s7] sm:$0xff] }
   0xb   :  { %449 = vmatprep.subr.mxu0 %v499_v0  ;;  %463 = vmatmul.mubr.msk.f32.vlgmr.msra.gmra.mxu1 %vm130_vm1, %v596_v10  ;;  %v415_v49 = vld [vmem:[%s671_s8] ss:$0 sm:$0xff] }
   0xc   :  { %450 = vmatpush3.msra.mxu0 %v34_v11  ;;  %465 = vmatprep.subr.mxu1 %v499_v0 }
   0xd   :  { %452 = vmatmul.mubr.msk.f32.vlgmr.msra.gmra.mxu0 %vm47_vm2, %v33_v12  ;;  %466 = vmatpush3.msra.mxu1 %v125_v13 }
   0xe   :  { %467 = vmatprep.subr.mxu1 %v499_v0  ;;  %473 = vmatprep.mubr.msk.f32.mxu1 %vm500_vm0, %v499_v0 }
   0xf   :  { %476 = vmatprep.subr.mxu0 %v499_v0  ;;  %484 = vmatprep.mubr.msk.f32.mxu0 %vm500_vm0, %v499_v0 }
  0x10   :  { %468 = vmatpush3.msra.mxu1 %v124_v14  ;;  %477 = vmatpush3.msra.mxu0 %v316_v37 }
  0x11   :  { %469 = vmatprep.subr.mxu1 %v499_v0  ;;  %478 = vmatprep.subr.mxu0 %v499_v0 }
  0x12   :  { %470 = vmatpush3.msra.mxu1 %v123_v15  ;;  %479 = vmatpush3.msra.mxu0 %v315_v38 }
  0x13   :  { %471 = vmatprep.subr.mxu1 %v499_v0  ;;  %480 = vmatprep.subr.mxu0 %v499_v0 }
  0x14   :  { %472 = vmatpush3.msra.mxu1 %v122_v16  ;;  %481 = vmatpush3.msra.mxu0 %v314_v39 }
  0x15   :  { %482 = vmatprep.subr.mxu0 %v499_v0 }
  0x16   :  { %483 = vmatpush3.msra.mxu0 %v313_v41 }
  0xcb   :  { %v200_v18 = vpop.f32.mrf.mxu1 }
  0xcd   :  { %v117_v19 = vpop.f32.mrf.mxu0  ;;  %v464_v20 = vpop.f32.mrf.mxu1 }
  0xce   :  { %v118_v21 = vadd.f32 %v409_v17, %v117_v19 }
  0xcf   :  { %v453_v22 = vpop.f32.mrf.mxu0 }
  0xd0   :  { %v121_v23 = vmax.f32 %v118_v21, 0.0 }
  0xd2   :  { %474 = vmatmul.mubr.msk.f32.vlgmr.msra.gmra.mxu1 %vm130_vm1, %v121_v23 }
 0x192   :  { %v273_v24 = vpop.f32.mrf.mxu1 }
 0x193   :  { %v274_v26 = vadd.f32 %v273_v24, %v200_v18 }
 0x194   :  { %v475_v27 = vpop.f32.mrf.mxu1 }
 0x195   :  { %v284_v28 = vadd.f32 %v413_v25, %v274_v26 }
 0x197   :  { %292 = vrot.lane.b32.xlu0 %v284_v28, %s501_s4  ;;  %v414_v29 = vmul.f32 -1.442695, %v284_v28 }
 0x199   :  { %493 = vpow2.f32 %v414_v29 }
 0x1a6   :  { %v494_v30 = vpop.eup %493 }
 0x1a7   :  { %v288_v31 = vadd.f32 1.0, %v494_v30 }
 0x1a9   :  { %495 = vrcp.f32 %v288_v31 }
 0x1b6   :  { %v496_v32 = vpop.eup %495 }
 0x1b7   :  { %v302_v43 = vsub.f32 1.0, %v496_v32 }
 0x209   :  { %v293_v33 = vpop.permute.xlu0 %292 }
 0x20a   :  { %v295_v34 = vmul.f32 %v496_v32, %v293_v33 }
 0x20c   :  { %297 = vrot.lane.b32.xlu0 %v295_v34, %s502_s3 }
 0x27e   :  { %v298_v35 = vpop.permute.xlu0 %297 }
 0x27f   :  { %v300_v36 = vadd.f32 %v298_v35, %v284_v28 }
 0x281   :  { %497 = vtanh.f32 %v300_v36 }
 0x28e   :  { %v498_v40 = vpop.eup %497 }
 0x28f   :  { %304 = vrot.lane.b32.xlu1 %v498_v40, %s503_s25 }
 0x293   :  { %308 = vrot.lane.b32.xlu1 %v596_v10, %s501_s4 }
 0x301   :  { %v305_v42 = vpop.permute.xlu1 %304 }
 0x302   :  { %v307_v45 = vmul.f32 %v305_v42, %v302_v43 }
 0x305   :  { %v309_v44 = vpop.permute.xlu1 %308 }
 0x306   :  { %v311_v46 = vmul.f32 %v496_v32, %v309_v44 }
 0x308   :  { %v312_v47 = vadd.f32 %v311_v46, %v307_v45 }
 0x30a   :  { %400 = vrot.lane.b32.xlu1 %v312_v47, %s504_s28  ;;  %325 = vrot.lane.b32.xlu0 %v312_v47, %s503_s25 }
 0x37c   :  { %v326_v48 = vpop.permute.xlu0 %325  ;;  %v401_v53 = vpop.permute.xlu1 %400 }
 0x37d   :  { %485 = vmatmul.mubr.msk.f32.vlgmr.msra.gmra.mxu0 %vm130_vm1, %v326_v48 }
 0x43d   :  { %v395_v50 = vpop.f32.mrf.mxu0 }
 0x43e   :  { %v396_v51 = vadd.f32 %v415_v49, %v395_v50 }
 0x43f   :  { %v486_v52 = vpop.f32.mrf.mxu0 }
 0x440   :  { %399 = vst [vmem:[%s672_s9] sm:$0xff] %v396_v51 }
 0x441   :  { %404 = vst.msk [vmem:[%s672_s9] sm:$0xff] %vm403_vm3, %v401_v53 }

</bundles_post_ra>
